<compile_context>
chip_gen: v6e
topology: v6e:2x2x1
jax: 0.10.0
libtpu: 0.0.40
codegen_flags: <defaults>
</compile_context>

<pallas_src>
import jax
import jax.numpy as jnp
from jax.experimental import pallas as pl
from jax.experimental.pallas import tpu as pltpu

# ---------------- config (mirrors DiVAE.__init__ / config.model) -------------
INPUT_DIM            = 256          # self._input_dimension (= C*H*W of input)
N_LATENT_NODES       = 32           # config.model.n_latent_nodes
N_LATENT_HIERARCHY   = 2            # config.model.n_latent_hierarchy_lvls
N_ENC_LAYER_NODES    = 64           # config.model.n_encoder_layer_nodes
N_ENC_LAYERS         = 2            # config.model.n_encoder_layers
DECODER_HIDDEN_NODES = [64, 128]    # config.model.decoder_hidden_nodes
# activation_fct chosen as ReLU (passed into DiVAE as self._activation_fct)

# the fused kernel below is written out explicitly for this structure
assert N_LATENT_HIERARCHY == 2 and N_ENC_LAYERS == 2 and len(DECODER_HIDDEN_NODES) == 2


# ------------------------------ fused Pallas kernel ---------------------------

def _divae_fused_kernel(x_ref, lu_ref, w_in_ref, w64_ref, ws0_ref, wout_ref,
                        b_ref, act_ref, post_ref):
    f32, bf16 = jnp.float32, jnp.bfloat16
    nl = N_LATENT_NODES              # 32
    ne = N_ENC_LAYER_NODES           # 64
    dh0, dh1 = DECODER_HIDDEN_NODES  # 64, 128

    bias = b_ref[...]                # (8, 256) f32, one zero-padded row per layer

    def brow(r, w):                  # (1, w) bias row -> broadcasts over batch tile
        return bias[r:r + 1, :w]

    def dot(a, w):                   # bf16 operands, f32 MXU accumulation
        return jnp.dot(a.astype(bf16), w, preferred_element_type=f32)

    x = x_ref[...]                   # RAW input; centering folded into bias row 0
    lu = lu_ref[...]                 # logit(u) noise, (B, 2*nl)

    # ---- fused first layers of both hierarchy levels: x @ [e0w0 | e1w0x] ----
    xw = dot(x, w_in_ref[...]) + brow(0, 2 * ne)          # (B, 128)
    h = jnp.maximum(xw[:, :ne], 0.0)                      # level-0 first hidden
    x1 = xw[:, ne:]                                       # level-1 x-term (bias folded)

    # ---- hierarchy level 0 ----
    h = jnp.maximum(dot(h, w64_ref[0])[:, :ne] + brow(1, ne), 0.0)
    logits0 = dot(h, w64_ref[1])[:, :nl] + brow(2, nl)
    # TODO(synk): reference uses a SpikeAndExponentialSmoother reparameterised
    # posterior (class not provided); Bernoulli thresholding against the
    # precomputed logit(u) noise is used instead (inference-style forward).
    s0 = jnp.where(logits0 > lu[:, :nl], 1.0, 0.0)

    # ---- hierarchy level 1: conditions on [x_centered, s0] ----
    h = jnp.maximum(x1 + dot(s0, ws0_ref[...]), 0.0)
    h = jnp.maximum(dot(h, w64_ref[2])[:, :ne] + brow(3, ne), 0.0)
    logits1 = dot(h, w64_ref[3])[:, :nl] + brow(4, nl)
    s1 = jnp.where(logits1 > lu[:, nl:], 1.0, 0.0)

    # ---- decoder on z = [s0 | s1] (single dot), ReLU hidden, Identity output ----
    z = jnp.concatenate([s0, s1], axis=1)                 # (B, 64), reused for post
    h = jnp.maximum(dot(z, w64_ref[4])[:, :dh0] + brow(5, dh0), 0.0)
    h = jnp.maximum(dot(h, w64_ref[5])[:, :dh1] + brow(6, dh1), 0.0)
    act_ref[...] = dot(h, wout_ref[...]) + brow(7, INPUT_DIM)   # train_bias folded in

    # lane-dense packed posterior (B, 128): [logits0 | logits1 | s0 | s1]
    post_ref[...] = jnp.concatenate([logits0, logits1, z], axis=1)


# ------------------------- parameter init (deterministic) ---------------------

def init_linear(key, fan_in, fan_out):
    kw, kb = jax.random.split(key)
    bound = 1.0 / jnp.sqrt(jnp.float32(fan_in))
    w = jax.random.uniform(kw, (fan_in, fan_out), jnp.float32, -bound, bound)
    b = jax.random.uniform(kb, (1, fan_out), jnp.float32, -bound, bound)
    return w, b                                     # f32 masters; packed to bf16 later


def init_divae_params(key):
    keys = iter(jax.random.split(key, 64))
    # Hierarchical encoder: one MLP per level; level lvl input dim = D + lvl*n_latent
    enc = []
    for lvl in range(N_LATENT_HIERARCHY):
        d = INPUT_DIM + lvl * N_LATENT_NODES
        layers = []
        for _ in range(N_ENC_LAYERS):
            layers.append(init_linear(next(keys), d, N_ENC_LAYER_NODES))
            d = N_ENC_LAYER_NODES
        layers.append(init_linear(next(keys), d, N_LATENT_NODES))   # -> logits
        enc.append(layers)
    # BasicDecoder node sequence: [n_latent * n_hierarchy] + hidden + [input_dim]
    dec_nodes = [N_LATENT_NODES * N_LATENT_HIERARCHY] + DECODER_HIDDEN_NODES + [INPUT_DIM]
    dec = [init_linear(next(keys), dec_nodes[i], dec_nodes[i + 1])
           for i in range(len(dec_nodes) - 1)]
    return {"encoder": enc, "decoder": dec}


# --------------------------- host-side weight packing -------------------------

def _pack_params(params, dataset_mean, train_bias):
    """Fuse same-input first layers, fold centering + train_bias into biases,
    and zero-pad everything into a few lane-aligned slabs (bf16 weights)."""
    (e0w0, e0b0), (e0w1, e0b1), (e0wl, e0bl) = params["encoder"][0]
    (e1w0, e1b0), (e1w1, e1b1), (e1wl, e1bl) = params["encoder"][1]
    (d0w, d0b), (d1w, d1b), (d2w, d2b) = params["decoder"]

    # level-1 first layer consumes [x_centered, samples_0]; split at INPUT_DIM
    e1w0x, e1w0s = e1w0[:INPUT_DIM], e1w0[INPUT_DIM:]

    # fused first layers of both levels, fed by RAW x; centering folded into bias
    w_in = jnp.concatenate([e0w0, e1w0x], axis=1)                   # (256, 128)
    b_in = jnp.concatenate([e0b0, e1b0], axis=1) - dataset_mean @ w_in

    def padc(w, n=128):       # zero-pad columns to a full lane tile
        return jnp.pad(w, ((0, 0), (0, n - w.shape[1])))

    w64 = jnp.stack([padc(e0w1), padc(e0wl), padc(e1w1),
                     padc(e1wl), padc(d0w), padc(d1w)])             # (6, 64, 128)

    def padb(b, n=INPUT_DIM):
        return jnp.pad(b, ((0, 0), (0, n - b.shape[1])))

    bias = jnp.concatenate(
        [padb(b_in), padb(e0b1), padb(e0bl), padb(e1b1), padb(e1bl),
         padb(d0b), padb(d1b), d2b + train_bias], axis=0)           # (8, 256) f32

    bf16 = jnp.bfloat16
    return (w_in.astype(bf16), w64.astype(bf16), e1w0s.astype(bf16),
            d2w.astype(bf16), bias)


# ------------------------------- forward (wrapper) -----------------------------

def _choose_block_b(bp):
    # Multiple of 8 (full sublanes), capped at 256 (fills the 256-wide MXU on
    # v6e/v7x; two clean passes on v5e's 128x128) and >=2 grid steps whenever
    # bp > 8 so the "parallel" batch axis can shard across both v7x TensorCores.
    if bp <= 8:
        return int(bp)
    half = -(-bp // 2)
    half = -(-half // 8) * 8
    return int(min(256, half))


def divae_forward(params, x, dataset_mean, train_bias, noise):
    B = x.shape[0]
    x_flat = x.reshape(B, INPUT_DIM).astype(jnp.float32)   # in_data.view(-1, D)
    u = jnp.concatenate(list(noise), axis=1)               # (B, n_hier * n_latent)
    # sigmoid(logits) > u  <=>  logits > logit(u): no in-kernel sigmoids needed
    logit_u = jnp.log(u) - jnp.log1p(-u)

    w_in, w64, ws0, wout, bias = _pack_params(params, dataset_mean, train_bias)

    # pad the batch to a sublane multiple so every store is a full tile
    bp = -(-B // 8) * 8
    if bp != B:
        x_flat = jnp.pad(x_flat, ((0, bp - B), (0, 0)))
        logit_u = jnp.pad(logit_u, ((0, bp - B), (0, 0)))

    block_b = _choose_block_b(bp)
    grid = (pl.cdiv(bp, block_b),)

    n_noise = N_LATENT_HIERARCHY * N_LATENT_NODES           # 64
    n_post = 2 * N_LATENT_HIERARCHY * N_LATENT_NODES        # 128 -> lane dense

    def row_spec(feat):       # batch-blocked activations / outputs
        return pl.BlockSpec((block_b, feat), lambda i: (i, 0))

    def const_spec(arr):      # grid-invariant weight/bias slabs
        nd = arr.ndim
        return pl.BlockSpec(arr.shape, lambda i, _nd=nd: (0,) * _nd)

    flops = 2 * bp * (INPUT_DIM * 2 * N_ENC_LAYER_NODES     # fused x layer
                      + 5 * N_ENC_LAYER_NODES * 128         # 64-in slab dots (padded)
                      + N_LATENT_NODES * N_ENC_LAYER_NODES  # s0 path
                      + DECODER_HIDDEN_NODES[1] * INPUT_DIM)
    weight_bytes = 2 * (w_in.size + w64.size + ws0.size + wout.size) + 4 * bias.size
    io_bytes = 4 * bp * (INPUT_DIM + n_noise + INPUT_DIM + n_post)

    act, post = pl.pallas_call(
        _divae_fused_kernel,
        grid=grid,
        in_specs=[row_spec(INPUT_DIM), row_spec(n_noise),
                  const_spec(w_in), const_spec(w64), const_spec(ws0),
                  const_spec(wout), const_spec(bias)],
        out_specs=(row_spec(INPUT_DIM), row_spec(n_post)),
        out_shape=(jax.ShapeDtypeStruct((bp, INPUT_DIM), jnp.float32),
                   jax.ShapeDtypeStruct((bp, n_post), jnp.float32)),
        compiler_params=pltpu.CompilerParams(
            dimension_semantics=("parallel",)),
        cost_estimate=pl.CostEstimate(flops=flops, transcendentals=0,
                                      bytes_accessed=io_bytes + weight_bytes),
    )(x_flat, logit_u, w_in, w64, ws0, wout, bias)

    act = act[:B]
    post = post[:B]
    out = jax.nn.sigmoid(act)     # sigmoid(Bernoulli(logit=act).logits), in wrapper

    nl, nh = N_LATENT_NODES, N_LATENT_HIERARCHY
    post_logits = [post[:, lvl * nl:(lvl + 1) * nl] for lvl in range(nh)]
    post_samples = [post[:, (nh + lvl) * nl:(nh + lvl + 1) * nl] for lvl in range(nh)]
    # output_distribution is Bernoulli(logit=act): represented by its logits (= act).
    return out, act, post_logits, post_samples


if __name__ == "__main__":
    key = jax.random.PRNGKey(0)
    k_x, k_mean, k_noise, k_params = jax.random.split(key, 4)

    B, C, H, W = 2, 1, 16, 16                             # C*H*W == INPUT_DIM
    x = jax.random.uniform(k_x, (B, C, H, W), jnp.float32)

    dataset_mean = jax.random.uniform(k_mean, (1, INPUT_DIM), jnp.float32, 0.05, 0.95)
    clipped_mean = jnp.clip(dataset_mean, 0.001, 0.999)
    train_bias = -jnp.log(1.0 / clipped_mean - 1.0)       # DiVAE.set_train_bias

    noise = [jax.random.uniform(jax.random.fold_in(k_noise, lvl),
                                (B, N_LATENT_NODES), jnp.float32)
             for lvl in range(N_LATENT_HIERARCHY)]

    params = init_divae_params(k_params)

    fwd = jax.jit(divae_forward)
    out, act, post_logits, post_samples = fwd(params, x, dataset_mean, train_bias, noise)
    jax.block_until_ready((out, act, post_logits, post_samples))

    assert out.shape == (B, INPUT_DIM)
    assert act.shape == (B, INPUT_DIM)
    assert all(l.shape == (B, N_LATENT_NODES) for l in post_logits)
    assert all(s.shape == (B, N_LATENT_NODES) for s in post_samples)
    assert bool(jnp.all((out >= 0.0) & (out <= 1.0)))
    assert all(bool(jnp.all(jnp.abs(s - 0.5) == 0.5)) for s in post_samples)  # binary
    print("KERNEL_OK")
</pallas_src>

<mosaic_0001>
module attributes {stable_mosaic.version = 11 : i64} {
  func.func @_divae_fused_kernel(%arg0: i32, %arg1: memref<8x256xf32, #tpu.memory_space<vmem>>, %arg2: memref<8x64xf32, #tpu.memory_space<vmem>>, %arg3: memref<256x128xbf16, #tpu.memory_space<vmem>>, %arg4: memref<6x64x128xbf16, #tpu.memory_space<vmem>>, %arg5: memref<32x64xbf16, #tpu.memory_space<vmem>>, %arg6: memref<128x256xbf16, #tpu.memory_space<vmem>>, %arg7: memref<8x256xf32, #tpu.memory_space<vmem>>, %arg8: memref<8x256xf32, #tpu.memory_space<vmem>>, %arg9: memref<8x128xf32, #tpu.memory_space<vmem>>) attributes {dimension_semantics = [#tpu.dimension_semantics<parallel>], iteration_bounds = array<i64: 1>, scalar_prefetch = 0 : i64, scratch_operands = 0 : i64, tpu.core_type = #tpu.core_type<tc>, window_params = [{transform_indices = @transform_0, window_bounds = array<i64: 8, 256>}, {transform_indices = @transform_1, window_bounds = array<i64: 8, 64>}, {pipeline_mode = #tpu.pipeline_mode<synchronous>, transform_indices = @transform_2, window_bounds = array<i64: 256, 128>}, {pipeline_mode = #tpu.pipeline_mode<synchronous>, transform_indices = @transform_3, window_bounds = array<i64: 6, 64, 128>}, {pipeline_mode = #tpu.pipeline_mode<synchronous>, transform_indices = @transform_4, window_bounds = array<i64: 32, 64>}, {pipeline_mode = #tpu.pipeline_mode<synchronous>, transform_indices = @transform_5, window_bounds = array<i64: 128, 256>}, {pipeline_mode = #tpu.pipeline_mode<synchronous>, transform_indices = @transform_6, window_bounds = array<i64: 8, 256>}, {transform_indices = @transform_7, window_bounds = array<i64: 8, 256>}, {transform_indices = @transform_8, window_bounds = array<i64: 8, 128>}]} {
    %c0 = arith.constant 0 : index
    %c0_0 = arith.constant 0 : index
    %0 = vector.load %arg7[%c0, %c0_0] : memref<8x256xf32, #tpu.memory_space<vmem>>, vector<8x256xf32>
    %c0_1 = arith.constant 0 : index
    %c0_2 = arith.constant 0 : index
    %1 = vector.load %arg1[%c0_1, %c0_2] : memref<8x256xf32, #tpu.memory_space<vmem>>, vector<8x256xf32>
    %c0_3 = arith.constant 0 : index
    %c0_4 = arith.constant 0 : index
    %2 = vector.load %arg2[%c0_3, %c0_4] : memref<8x64xf32, #tpu.memory_space<vmem>>, vector<8x64xf32>
    %c0_5 = arith.constant 0 : index
    %c0_6 = arith.constant 0 : index
    %3 = vector.load %arg3[%c0_5, %c0_6] : memref<256x128xbf16, #tpu.memory_space<vmem>>, vector<256x128xbf16>
    %4 = arith.truncf %1 : vector<8x256xf32> to vector<8x256xbf16>
    %cst = arith.constant dense<0.000000e+00> : vector<8x128xf32>
    %5 = tpu.matmul %4, %3, %cst {dimension_numbers = #tpu.dot_dimension_numbers<[1], [0], [0], [1], [0, 0, 1, 1], [], []>} : vector<8x256xbf16>, vector<256x128xbf16>, vector<8x128xf32> -> vector<8x128xf32>
    %6 = vector.extract_strided_slice %0 {offsets = [0, 0], sizes = [1, 128], strides = [1, 1]} : vector<8x256xf32> to vector<1x128xf32>
    %7 = vector.broadcast %6 : vector<1x128xf32> to vector<8x128xf32>
    %8 = arith.addf %5, %7 : vector<8x128xf32>
    %9 = vector.extract_strided_slice %8 {offsets = [0, 0], sizes = [8, 64], strides = [1, 1]} : vector<8x128xf32> to vector<8x64xf32>
    %cst_7 = arith.constant 0.000000e+00 : f32
    %10 = vector.broadcast %cst_7 : f32 to vector<8x64xf32>
    %11 = arith.maximumf %9, %10 : vector<8x64xf32>
    %12 = vector.extract_strided_slice %8 {offsets = [0, 64], sizes = [8, 64], strides = [1, 1]} : vector<8x128xf32> to vector<8x64xf32>
    %c0_8 = arith.constant 0 : index
    %c0_9 = arith.constant 0 : index
    %c0_10 = arith.constant 0 : index
    %13 = vector.load %arg4[%c0_8, %c0_9, %c0_10] : memref<6x64x128xbf16, #tpu.memory_space<vmem>>, vector<1x64x128xbf16>
    %14 = vector.shape_cast %13 : vector<1x64x128xbf16> to vector<64x128xbf16>
    %15 = arith.truncf %11 : vector<8x64xf32> to vector<8x64xbf16>
    %cst_11 = arith.constant dense<0.000000e+00> : vector<8x128xf32>
    %16 = tpu.matmul %15, %14, %cst_11 {dimension_numbers = #tpu.dot_dimension_numbers<[1], [0], [0], [1], [0, 0, 1, 1], [], []>} : vector<8x64xbf16>, vector<64x128xbf16>, vector<8x128xf32> -> vector<8x128xf32>
    %17 = vector.extract_strided_slice %16 {offsets = [0, 0], sizes = [8, 64], strides = [1, 1]} : vector<8x128xf32> to vector<8x64xf32>
    %18 = vector.extract_strided_slice %0 {offsets = [1, 0], sizes = [1, 64], strides = [1, 1]} : vector<8x256xf32> to vector<1x64xf32>
    %19 = vector.broadcast %18 : vector<1x64xf32> to vector<8x64xf32>
    %20 = arith.addf %17, %19 : vector<8x64xf32>
    %cst_12 = arith.constant 0.000000e+00 : f32
    %21 = vector.broadcast %cst_12 : f32 to vector<8x64xf32>
    %22 = arith.maximumf %20, %21 : vector<8x64xf32>
    %c1 = arith.constant 1 : index
    %c0_13 = arith.constant 0 : index
    %c0_14 = arith.constant 0 : index
    %23 = vector.load %arg4[%c1, %c0_13, %c0_14] : memref<6x64x128xbf16, #tpu.memory_space<vmem>>, vector<1x64x128xbf16>
    %24 = vector.shape_cast %23 : vector<1x64x128xbf16> to vector<64x128xbf16>
    %25 = arith.truncf %22 : vector<8x64xf32> to vector<8x64xbf16>
    %cst_15 = arith.constant dense<0.000000e+00> : vector<8x128xf32>
    %26 = tpu.matmul %25, %24, %cst_15 {dimension_numbers = #tpu.dot_dimension_numbers<[1], [0], [0], [1], [0, 0, 1, 1], [], []>} : vector<8x64xbf16>, vector<64x128xbf16>, vector<8x128xf32> -> vector<8x128xf32>
    %27 = vector.extract_strided_slice %26 {offsets = [0, 0], sizes = [8, 32], strides = [1, 1]} : vector<8x128xf32> to vector<8x32xf32>
    %28 = vector.extract_strided_slice %0 {offsets = [2, 0], sizes = [1, 32], strides = [1, 1]} : vector<8x256xf32> to vector<1x32xf32>
    %29 = vector.broadcast %28 : vector<1x32xf32> to vector<8x32xf32>
    %30 = arith.addf %27, %29 : vector<8x32xf32>
    %31 = vector.extract_strided_slice %2 {offsets = [0, 0], sizes = [8, 32], strides = [1, 1]} : vector<8x64xf32> to vector<8x32xf32>
    %32 = arith.cmpf ogt, %30, %31 : vector<8x32xf32>
    %cst_16 = arith.constant 1.000000e+00 : f32
    %cst_17 = arith.constant 0.000000e+00 : f32
    %33 = vector.broadcast %cst_16 : f32 to vector<8x32xf32>
    %34 = vector.broadcast %cst_17 : f32 to vector<8x32xf32>
    %35 = arith.select %32, %33, %34 : vector<8x32xi1>, vector<8x32xf32>
    %c0_18 = arith.constant 0 : index
    %c0_19 = arith.constant 0 : index
    %36 = vector.load %arg5[%c0_18, %c0_19] : memref<32x64xbf16, #tpu.memory_space<vmem>>, vector<32x64xbf16>
    %37 = arith.truncf %35 : vector<8x32xf32> to vector<8x32xbf16>
    %cst_20 = arith.constant dense<0.000000e+00> : vector<8x64xf32>
    %38 = tpu.matmul %37, %36, %cst_20 {dimension_numbers = #tpu.dot_dimension_numbers<[1], [0], [0], [1], [0, 0, 1, 1], [], []>} : vector<8x32xbf16>, vector<32x64xbf16>, vector<8x64xf32> -> vector<8x64xf32>
    %39 = arith.addf %12, %38 : vector<8x64xf32>
    %cst_21 = arith.constant 0.000000e+00 : f32
    %40 = vector.broadcast %cst_21 : f32 to vector<8x64xf32>
    %41 = arith.maximumf %39, %40 : vector<8x64xf32>
    %c2 = arith.constant 2 : index
    %c0_22 = arith.constant 0 : index
    %c0_23 = arith.constant 0 : index
    %42 = vector.load %arg4[%c2, %c0_22, %c0_23] : memref<6x64x128xbf16, #tpu.memory_space<vmem>>, vector<1x64x128xbf16>
    %43 = vector.shape_cast %42 : vector<1x64x128xbf16> to vector<64x128xbf16>
    %44 = arith.truncf %41 : vector<8x64xf32> to vector<8x64xbf16>
    %cst_24 = arith.constant dense<0.000000e+00> : vector<8x128xf32>
    %45 = tpu.matmul %44, %43, %cst_24 {dimension_numbers = #tpu.dot_dimension_numbers<[1], [0], [0], [1], [0, 0, 1, 1], [], []>} : vector<8x64xbf16>, vector<64x128xbf16>, vector<8x128xf32> -> vector<8x128xf32>
    %46 = vector.extract_strided_slice %45 {offsets = [0, 0], sizes = [8, 64], strides = [1, 1]} : vector<8x128xf32> to vector<8x64xf32>
    %47 = vector.extract_strided_slice %0 {offsets = [3, 0], sizes = [1, 64], strides = [1, 1]} : vector<8x256xf32> to vector<1x64xf32>
    %48 = vector.broadcast %47 : vector<1x64xf32> to vector<8x64xf32>
    %49 = arith.addf %46, %48 : vector<8x64xf32>
    %cst_25 = arith.constant 0.000000e+00 : f32
    %50 = vector.broadcast %cst_25 : f32 to vector<8x64xf32>
    %51 = arith.maximumf %49, %50 : vector<8x64xf32>
    %c3 = arith.constant 3 : index
    %c0_26 = arith.constant 0 : index
    %c0_27 = arith.constant 0 : index
    %52 = vector.load %arg4[%c3, %c0_26, %c0_27] : memref<6x64x128xbf16, #tpu.memory_space<vmem>>, vector<1x64x128xbf16>
    %53 = vector.shape_cast %52 : vector<1x64x128xbf16> to vector<64x128xbf16>
    %54 = arith.truncf %51 : vector<8x64xf32> to vector<8x64xbf16>
    %cst_28 = arith.constant dense<0.000000e+00> : vector<8x128xf32>
    %55 = tpu.matmul %54, %53, %cst_28 {dimension_numbers = #tpu.dot_dimension_numbers<[1], [0], [0], [1], [0, 0, 1, 1], [], []>} : vector<8x64xbf16>, vector<64x128xbf16>, vector<8x128xf32> -> vector<8x128xf32>
    %56 = vector.extract_strided_slice %55 {offsets = [0, 0], sizes = [8, 32], strides = [1, 1]} : vector<8x128xf32> to vector<8x32xf32>
    %57 = vector.extract_strided_slice %0 {offsets = [4, 0], sizes = [1, 32], strides = [1, 1]} : vector<8x256xf32> to vector<1x32xf32>
    %58 = vector.broadcast %57 : vector<1x32xf32> to vector<8x32xf32>
    %59 = arith.addf %56, %58 : vector<8x32xf32>
    %60 = vector.extract_strided_slice %2 {offsets = [0, 32], sizes = [8, 32], strides = [1, 1]} : vector<8x64xf32> to vector<8x32xf32>
    %61 = arith.cmpf ogt, %59, %60 : vector<8x32xf32>
    %cst_29 = arith.constant 1.000000e+00 : f32
    %cst_30 = arith.constant 0.000000e+00 : f32
    %62 = vector.broadcast %cst_29 : f32 to vector<8x32xf32>
    %63 = vector.broadcast %cst_30 : f32 to vector<8x32xf32>
    %64 = arith.select %61, %62, %63 : vector<8x32xi1>, vector<8x32xf32>
    %65 = tpu.concatenate %35, %64 in 1 : vector<8x32xf32>, vector<8x32xf32> -> vector<8x64xf32>
    %c4 = arith.constant 4 : index
    %c0_31 = arith.constant 0 : index
    %c0_32 = arith.constant 0 : index
    %66 = vector.load %arg4[%c4, %c0_31, %c0_32] : memref<6x64x128xbf16, #tpu.memory_space<vmem>>, vector<1x64x128xbf16>
    %67 = vector.shape_cast %66 : vector<1x64x128xbf16> to vector<64x128xbf16>
    %68 = arith.truncf %65 : vector<8x64xf32> to vector<8x64xbf16>
    %cst_33 = arith.constant dense<0.000000e+00> : vector<8x128xf32>
    %69 = tpu.matmul %68, %67, %cst_33 {dimension_numbers = #tpu.dot_dimension_numbers<[1], [0], [0], [1], [0, 0, 1, 1], [], []>} : vector<8x64xbf16>, vector<64x128xbf16>, vector<8x128xf32> -> vector<8x128xf32>
    %70 = vector.extract_strided_slice %69 {offsets = [0, 0], sizes = [8, 64], strides = [1, 1]} : vector<8x128xf32> to vector<8x64xf32>
    %71 = vector.extract_strided_slice %0 {offsets = [5, 0], sizes = [1, 64], strides = [1, 1]} : vector<8x256xf32> to vector<1x64xf32>
    %72 = vector.broadcast %71 : vector<1x64xf32> to vector<8x64xf32>
    %73 = arith.addf %70, %72 : vector<8x64xf32>
    %cst_34 = arith.constant 0.000000e+00 : f32
    %74 = vector.broadcast %cst_34 : f32 to vector<8x64xf32>
    %75 = arith.maximumf %73, %74 : vector<8x64xf32>
    %c5 = arith.constant 5 : index
    %c0_35 = arith.constant 0 : index
    %c0_36 = arith.constant 0 : index
    %76 = vector.load %arg4[%c5, %c0_35, %c0_36] : memref<6x64x128xbf16, #tpu.memory_space<vmem>>, vector<1x64x128xbf16>
    %77 = vector.shape_cast %76 : vector<1x64x128xbf16> to vector<64x128xbf16>
    %78 = arith.truncf %75 : vector<8x64xf32> to vector<8x64xbf16>
    %cst_37 = arith.constant dense<0.000000e+00> : vector<8x128xf32>
    %79 = tpu.matmul %78, %77, %cst_37 {dimension_numbers = #tpu.dot_dimension_numbers<[1], [0], [0], [1], [0, 0, 1, 1], [], []>} : vector<8x64xbf16>, vector<64x128xbf16>, vector<8x128xf32> -> vector<8x128xf32>
    %80 = vector.extract_strided_slice %0 {offsets = [6, 0], sizes = [1, 128], strides = [1, 1]} : vector<8x256xf32> to vector<1x128xf32>
    %81 = vector.broadcast %80 : vector<1x128xf32> to vector<8x128xf32>
    %82 = arith.addf %79, %81 : vector<8x128xf32>
    %cst_38 = arith.constant 0.000000e+00 : f32
    %83 = vector.broadcast %cst_38 : f32 to vector<8x128xf32>
    %84 = arith.maximumf %82, %83 : vector<8x128xf32>
    %c0_39 = arith.constant 0 : index
    %c0_40 = arith.constant 0 : index
    %85 = vector.load %arg6[%c0_39, %c0_40] : memref<128x256xbf16, #tpu.memory_space<vmem>>, vector<128x256xbf16>
    %86 = arith.truncf %84 : vector<8x128xf32> to vector<8x128xbf16>
    %cst_41 = arith.constant dense<0.000000e+00> : vector<8x256xf32>
    %87 = tpu.matmul %86, %85, %cst_41 {dimension_numbers = #tpu.dot_dimension_numbers<[1], [0], [0], [1], [0, 0, 1, 1], [], []>} : vector<8x128xbf16>, vector<128x256xbf16>, vector<8x256xf32> -> vector<8x256xf32>
    %88 = vector.extract_strided_slice %0 {offsets = [7, 0], sizes = [1, 256], strides = [1, 1]} : vector<8x256xf32> to vector<1x256xf32>
    %89 = vector.broadcast %88 : vector<1x256xf32> to vector<8x256xf32>
    %90 = arith.addf %87, %89 : vector<8x256xf32>
    %c0_42 = arith.constant 0 : index
    %c0_43 = arith.constant 0 : index
    %91 = vector.load %arg8[%c0_42, %c0_43] : memref<8x256xf32, #tpu.memory_space<vmem>>, vector<8x256xf32>
    tpu.vector_store %arg8[%c0_42, %c0_43], %90 {strides = array<i32>} : memref<8x256xf32, #tpu.memory_space<vmem>>, vector<8x256xf32>,
    %92 = tpu.concatenate %30, %59, %65 in 1 : vector<8x32xf32>, vector<8x32xf32>, vector<8x64xf32> -> vector<8x128xf32>
    %c0_44 = arith.constant 0 : index
    %c0_45 = arith.constant 0 : index
    %93 = vector.load %arg9[%c0_44, %c0_45] : memref<8x128xf32, #tpu.memory_space<vmem>>, vector<8x128xf32>
    tpu.vector_store %arg9[%c0_44, %c0_45], %92 {strides = array<i32>} : memref<8x128xf32, #tpu.memory_space<vmem>>, vector<8x128xf32>,
    return
  }
  func.func @transform_0(%arg0: i32) -> (i32, i32) {
    %c0_i32 = arith.constant 0 : i32
    %c0_i32_0 = arith.constant 0 : i32
    return %arg0, %c0_i32 : i32, i32
  }
  func.func @transform_1(%arg0: i32) -> (i32, i32) {
    %c0_i32 = arith.constant 0 : i32
    %c0_i32_0 = arith.constant 0 : i32
    return %arg0, %c0_i32 : i32, i32
  }
  func.func @transform_2(%arg0: i32) -> (i32, i32) {
    %c0_i32 = arith.constant 0 : i32
    %c0_i32_0 = arith.constant 0 : i32
    %c0_i32_1 = arith.constant 0 : i32
    return %c0_i32, %c0_i32_0 : i32, i32
  }
  func.func @transform_3(%arg0: i32) -> (i32, i32, i32) {
    %c0_i32 = arith.constant 0 : i32
    %c0_i32_0 = arith.constant 0 : i32
    %c0_i32_1 = arith.constant 0 : i32
    %c0_i32_2 = arith.constant 0 : i32
    return %c0_i32, %c0_i32_0, %c0_i32_1 : i32, i32, i32
  }
  func.func @transform_4(%arg0: i32) -> (i32, i32) {
    %c0_i32 = arith.constant 0 : i32
    %c0_i32_0 = arith.constant 0 : i32
    %c0_i32_1 = arith.constant 0 : i32
    return %c0_i32, %c0_i32_0 : i32, i32
  }
  func.func @transform_5(%arg0: i32) -> (i32, i32) {
    %c0_i32 = arith.constant 0 : i32
    %c0_i32_0 = arith.constant 0 : i32
    %c0_i32_1 = arith.constant 0 : i32
    return %c0_i32, %c0_i32_0 : i32, i32
  }
  func.func @transform_6(%arg0: i32) -> (i32, i32) {
    %c0_i32 = arith.constant 0 : i32
    %c0_i32_0 = arith.constant 0 : i32
    %c0_i32_1 = arith.constant 0 : i32
    return %c0_i32, %c0_i32_0 : i32, i32
  }
  func.func @transform_7(%arg0: i32) -> (i32, i32) {
    %c0_i32 = arith.constant 0 : i32
    %c0_i32_0 = arith.constant 0 : i32
    return %arg0, %c0_i32 : i32, i32
  }
  func.func @transform_8(%arg0: i32) -> (i32, i32) {
    %c0_i32 = arith.constant 0 : i32
    %c0_i32_0 = arith.constant 0 : i32
    return %arg0, %c0_i32 : i32, i32
  }
}

</mosaic_0001>

<bundles_post_ra>
// kernel: divae_forward.1
= control target key start
LH: loop header
LB: loop body
LE: loop exit
PB: predicated region body
PF: predicated region fallthrough
CT: control target
= control target key end

     0   :  { %v1266_v1 = vmov 0.0   ;;  %vm1267_vm0 = vmmov 0   ;;  %v68_v27 = vlaneseq  ;;  %vm242_vm1 = vcmask 523264   ;;  %s1269_s10 = smov 96   ;;  %s1603_s2 = inlined_call_operand.vmem [shape: bf16[256,128], index: 2, kind: input, shape index: {}]   ;;  %s1604_s0 = inlined_call_operand.vmem [shape: f32[8,256], index: 0, kind: input, shape index: {}]   ;;  %s1605_s3 = inlined_call_operand.vmem [shape: bf16[6,64,128], index: 3, kind: input, shape index: {}]   ;;  %s1606_s6 = inlined_call_operand.vmem [shape: f32[8,256], index: 6, kind: input, shape index: {}]   ;;  %s1607_s4 = inlined_call_operand.vmem [shape: bf16[32,64], index: 4, kind: input, shape index: {}]   ;;  %s1608_s1 = inlined_call_operand.vmem [shape: f32[8,64], index: 1, kind: input, shape index: {}]   ;;  %s1609_s5 = inlined_call_operand.vmem [shape: bf16[128,256], index: 5, kind: input, shape index: {}]   ;;  %s1610_s8 = inlined_call_operand.vmem [shape: f32[8,128], index: 8, kind: output, shape index: {1}]   ;;  %s1611_s7 = inlined_call_operand.vmem [shape: f32[8,256], index: 7, kind: output, shape index: {0}]  }
   0x1   :  { %v1200_v0 = vld [vmem:[%s1603_s2 + $0x78] sm:$0xff]   ;;  %1126 = vmatprep.subr.bf16.mxu1 %v1266_v1  ;;  %v1202_v3 = vld [vmem:[%s1603_s2 + $0x70] sm:$0xff]   ;;  %v1204_v5 = vld [vmem:[%s1603_s2 + $0x68] sm:$0xff]   ;;  %1134 = vmatprep.mubr.msk.bf16.mxu1 %vm1267_vm0, %v1266_v1  ;;  %vm393_vm3 = vcmask 261120  }
   0x2   :  { %v1201_v2 = vld [vmem:[%s1603_s2 + $0x38] sm:$0xff]   ;;  %1059 = vmatprep.subr.bf16.mxu0 %v1200_v0  ;;  %v1203_v4 = vld [vmem:[%s1603_s2 + $0x30] sm:$0xff]   ;;  %v1205_v6 = vld [vmem:[%s1603_s2 + $0x28] sm:$0xff]   ;;  %v1401_v28 = vshrl.u32 %v68_v27, 7 }
   0x3   :  { %1060 = vmatpush3.bf16.msra.mxu0 %v1201_v2  ;;  %v1206_v7 = vld [vmem:[%s1603_s2 + $0x60] sm:$0xff]   ;;  %v1208_v9 = vld [vmem:[%s1603_s2 + $0x58] sm:$0xff]   ;;  %v1210_v11 = vld [vmem:[%s1603_s2 + $0x50] sm:$0xff]  }
   0x4   :  { %1061 = vmatprep.subr.bf16.mxu0 %v1202_v3  ;;  %v1207_v8 = vld [vmem:[%s1603_s2 + $0x20] sm:$0xff]   ;;  %v1209_v10 = vld [vmem:[%s1603_s2 + $0x18] sm:$0xff]   ;;  %v32_v12 = vld [vmem:[%s1604_s0 + $0x8] sm:$0xff]  ;;  %v70_v29 = vsub.s32 0, %v1401_v28  ;;  %v288_v43 = vsub.s32 1, %v1401_v28  ;;  %v371_v53 = vsub.s32 2, %v1401_v28 }
   0x5   :  { %v1211_v13 = vld [vmem:[%s1603_s2 + $0x10] sm:$0xff]   ;;  %v67_v14 = vpack.c.bf16 %v32_v12, %v32_v12  ;;  %v1212_v15 = vld [vmem:[%s1603_s2 + $0x48] sm:$0xff]   ;;  %v1214_v17 = vld [vmem:[%s1603_s2 + $0x40] sm:$0xff]  }
   0x6   :  { %v1213_v16 = vld [vmem:[%s1603_s2 + $0x8] sm:$0xff]   ;;  %v1215_v18 = vld [vmem:[%s1603_s2] sm:$0xff]   ;;  %v1216_v20 = vld [vmem:[%s1605_s3 + $0x18] sm:$0xff]  }
   0x7   :  { %1062 = vmatpush3.bf16.msra.mxu0 %v1203_v4  ;;  %200 = vmatprep.mubr.bf16.mxu0 %v67_v14  ;;  %v31_v19 = vld [vmem:[%s1604_s0] sm:$0xff]  ;;  %v1217_v22 = vld [vmem:[%s1605_s3 + $0x10] sm:$0xff]   ;;  %v1218_v23 = vld [vmem:[%s1605_s3 + $0x8] sm:$0xff]   ;;  %s1268_s0 = smov 64  }
   0x8   :  { %1063 = vmatprep.subr.bf16.mxu0 %v1204_v5  ;;  %v66_v21 = vpack.c.bf16 %v31_v19, %v31_v19  ;;  %v1219_v24 = vld [vmem:[%s1605_s3] sm:$0xff]   ;;  %v1220_v25 = vld [vmem:[%s1605_s3 + $0x38] sm:$0xff]   ;;  %v1221_v26 = vld [vmem:[%s1605_s3 + $0x30] sm:$0xff]  }
   0x9   :  { %1127 = vmatpush3.bf16.msra.mxu1 %v1220_v25  ;;  %v1407_v30 = vld [vmem:[%s1606_s6] sm:$0xff]  ;;  %v1222_v40 = vld [vmem:[%s1605_s3 + $0x28] sm:$0xff]   ;;  %v1226_v63 = vld [vmem:[%s1605_s3 + $0x58] sm:$0xff]  }
   0xa   :  { %1128 = vmatprep.subr.bf16.mxu1 %v1266_v1  ;;  %v71_v32 = vrot.slane %v1407_v30, %v70_v29  ;;  %v1223_v41 = vld [vmem:[%s1605_s3 + $0x20] sm:$0xff]   ;;  %v1224_v42 = vld [vmem:[%s1607_s4 + $0x8] sm:$0xff]   ;;  %v289_v44 = vrot.slane %v1407_v30, %v288_v43  ;;  %v372_v54 = vrot.slane %v1407_v30, %v371_v53  ;;  %v1227_v0 = vld [vmem:[%s1605_s3 + $0x50] sm:$0xff]  }
   0xb   :  { %1064 = vmatpush3.bf16.msra.mxu0 %v1205_v6  ;;  %v1225_v52 = vld [vmem:[%s1607_s4] sm:$0xff]   ;;  %v1228_v3 = vld [vmem:[%s1605_s3 + $0x48] sm:$0xff]   ;;  %v1235_v27 = vld [vmem:[%s1605_s3 + $0x90] sm:$0xff]  }
   0xc   :  { %1065 = vmatprep.subr.bf16.mxu0 %v1206_v7  ;;  %v33_v55 = vld [vmem:[%s1608_s1] sm:$0xff]  ;;  %v1236_v29 = vld [vmem:[%s1605_s3 + $0x88] sm:$0xff]   ;;  %s1270_s1 = smov 32  }
   0xd   :  { %1129 = vmatpush3.bf16.msra.mxu1 %v1221_v26  ;;  %v1229_v6 = vld [vmem:[%s1605_s3 + $0x40] sm:$0xff]   ;;  %612 = vrot.lane.b32.xlu1 %v33_v55, %s1269_s10  ;;  %v1234_v26 = vld [vmem:[%s1605_s3 + $0x98] sm:$0xff]  }
   0xe   :  { %1130 = vmatprep.subr.bf16.mxu1 %v1266_v1  ;;  %v1253_v53 = vld [vmem:[%s1609_s5 + $0x44] ss:$8 sps:$4 sm:$0xff]  }
   0xf   :  { %1066 = vmatpush3.bf16.msra.mxu0 %v1207_v8  ;;  %v1230_v8 = vld [vmem:[%s1605_s3 + $0x78] sm:$0xff]  }
  0x10   :  { %1067 = vmatprep.subr.bf16.mxu0 %v1208_v9  ;;  %v1231_v9 = vld [vmem:[%s1605_s3 + $0x70] sm:$0xff]  }
  0x11   :  { %1131 = vmatpush3.bf16.msra.mxu1 %v1222_v40 }
  0x12   :  { %1132 = vmatprep.subr.bf16.mxu1 %v1266_v1 }
  0x13   :  { %1068 = vmatpush3.bf16.msra.mxu0 %v1209_v10 }
  0x14   :  { %1069 = vmatprep.subr.bf16.mxu0 %v1210_v11 }
  0x15   :  { %1133 = vmatpush3.bf16.msra.mxu1 %v1223_v41  ;;  %v1238_v41 = vld [vmem:[%s1605_s3 + $0xb8] sm:$0xff]  }
  0x16   :  { %1146 = vmatprep.subr.bf16.mxu1 %v1266_v1 }
  0x17   :  { %1070 = vmatpush3.bf16.msra.mxu0 %v1211_v13 }
  0x18   :  { %1071 = vmatprep.subr.bf16.mxu0 %v1212_v15  ;;  %v1232_v15 = vld [vmem:[%s1605_s3 + $0x68] sm:$0xff]  }
  0x1b   :  { %1072 = vmatpush3.bf16.msra.mxu0 %v1213_v16  ;;  %v1233_v16 = vld [vmem:[%s1605_s3 + $0x60] sm:$0xff]  }
  0x1c   :  { %1073 = vmatprep.subr.bf16.mxu0 %v1214_v17  ;;  %v525_v17 = vsub.s32 3, %v1401_v28 }
  0x1f   :  { %1074 = vmatpush3.bf16.msra.mxu0 %v1215_v18  ;;  %v526_v18 = vrot.slane %v1407_v30, %v525_v17 }
  0x20   :  { %1114 = vmatprep.subr.bf16.mxu0 %v1266_v1 }
  0x22   :  { %201 = vmatmul.mubr.bf16.vlgmr.msra.gmra.mxu0 %v66_v21 }
  0x23   :  { %1115 = vmatpush3.bf16.msra.mxu0 %v1216_v20  ;;  %1122 = vmatprep.mubr.msk.bf16.mxu0 %vm1267_vm0, %v1266_v1 }
  0x24   :  { %1116 = vmatprep.subr.bf16.mxu0 %v1266_v1 }
  0x27   :  { %1117 = vmatpush3.bf16.msra.mxu0 %v1217_v22 }
  0x28   :  { %1118 = vmatprep.subr.bf16.mxu0 %v1266_v1 }
  0x2b   :  { %1119 = vmatpush3.bf16.msra.mxu0 %v1218_v23 }
  0x2c   :  { %1120 = vmatprep.subr.bf16.mxu0 %v1266_v1 }
  0x2f   :  { %1121 = vmatpush3.bf16.msra.mxu0 %v1219_v24 }
  0x30   :  { %1138 = vmatprep.subr.bf16.mxu0 %v1266_v1 }
  0xe2   :  { %v1075_v31 = vpop.f32.mrf.mxu0 }
  0xe4   :  { %v1076_v33 = vpop.f32.mrf.mxu0 }
  0xe5   :  { %v1077_v34 = vadd.f32 %v1076_v33, %v1075_v31  ;;  %v1237_v31 = vld [vmem:[%s1605_s3 + $0x80] sm:$0xff]  }
  0xe6   :  { %v1078_v35 = vpop.f32.mrf.mxu0 }
  0xe7   :  { %v1410_v36 = vadd.f32 %v1077_v34, %v71_v32  ;;  %v608_v32 = vsub.s32 4, %v1401_v28  ;;  %v613_v35 = vpop.permute.xlu1 %612 }
  0xe8   :  { %v1079_v37 = vpop.f32.mrf.mxu0 }
  0xe9   :  { %v208_v38 = vmax.f32 %v1410_v36, 0.0  ;;  %v609_v33 = vrot.slane %v1407_v30, %v608_v32 }
  0xeb   :  { %v217_v39 = vpack.c.bf16 %v208_v38, %v208_v38 }
  0xed   :  { %1123 = vmatmul.mubr.msk.bf16.vlgmr.msra.gmra.mxu0 %vm242_vm1, %v217_v39 }
  0xee   :  { %1142 = vmatprep.mubr.msk.bf16.mxu0 %vm1267_vm0, %v1266_v1  ;;  %1139 = vmatpush3.bf16.msra.mxu0 %v1224_v42  ;;  %v1239_v42 = vld [vmem:[%s1605_s3 + $0xb0] sm:$0xff]  }
  0xef   :  { %1140 = vmatprep.subr.bf16.mxu0 %v1266_v1 }
  0xf2   :  { %1141 = vmatpush3.bf16.msra.mxu0 %v1225_v52  ;;  %v1248_v52 = vld [vmem:[%s1609_s5 + $0x50] ss:$8 sps:$4 sm:$0xff]  }
  0xf3   :  { %1158 = vmatprep.subr.bf16.mxu0 %v1266_v1 }
 0x1ad   :  { %v280_v45 = vpop.f32.mrf.mxu0 }
 0x1ae   :  { %v290_v46 = vadd.f32 %v289_v44, %v280_v45 }
 0x1af   :  { %v1124_v47 = vpop.f32.mrf.mxu0 }
 0x1b0   :  { %v291_v48 = vmax.f32 %v290_v46, 0.0  ;;  %v1240_v46 = vld [vmem:[%s1605_s3 + $0xa8] sm:$0xff]   ;;  %v1241_v47 = vld [vmem:[%s1605_s3 + $0xa0] sm:$0xff]  }
 0x1b1   :  { %v283_v49 = vpop.f32.mrf.mxu0 }
 0x1b2   :  { %v301_v50 = vpack.c.bf16 %v291_v48, %v291_v48  ;;  %v1242_v48 = vld [vmem:[%s1609_s5 + $0x70] ss:$8 sps:$4 sm:$0xff]   ;;  %v1244_v49 = vld [vmem:[%s1609_s5 + $0x74] ss:$8 sps:$4 sm:$0xff]  }
 0x1b3   :  { %v1125_v51 = vpop.f32.mrf.mxu0 }
 0x1b4   :  { %1135 = vmatmul.mubr.msk.bf16.vlgmr.msra.gmra.mxu1 %vm242_vm1, %v301_v50  ;;  %v1247_v50 = vld [vmem:[%s1609_s5 + $0x64] ss:$8 sps:$4 sm:$0xff]   ;;  %v1250_v51 = vld [vmem:[%s1609_s5 + $0x54] ss:$8 sps:$4 sm:$0xff]  }
 0x1b5   :  { %1154 = vmatprep.mubr.msk.bf16.mxu1 %vm1267_vm0, %v1266_v1  ;;  %1147 = vmatpush3.bf16.msra.mxu1 %v1226_v63 }
 0x1b6   :  { %1148 = vmatprep.subr.bf16.mxu1 %v1266_v1 }
 0x1b9   :  { %1149 = vmatpush3.bf16.msra.mxu1 %v1227_v0 }
 0x1ba   :  { %1150 = vmatprep.subr.bf16.mxu1 %v1266_v1 }
 0x1bd   :  { %1151 = vmatpush3.bf16.msra.mxu1 %v1228_v3  ;;  %v701_v3 = vsub.s32 5, %v1401_v28 }
 0x1be   :  { %1152 = vmatprep.subr.bf16.mxu1 %v1266_v1 }
 0x1c1   :  { %1153 = vmatpush3.bf16.msra.mxu1 %v1229_v6 }
 0x1c2   :  { %1170 = vmatprep.subr.bf16.mxu1 %v1266_v1 }
 0x274   :  { %v363_v56 = vpop.f32.mrf.mxu1 }
 0x275   :  { %v1442_v57 = vadd.f32 %v372_v54, %v363_v56  ;;  %v1251_v54 = vld [vmem:[%s1609_s5 + $0x40] ss:$8 sps:$4 sm:$0xff]   ;;  %v1254_v56 = vld [vmem:[%s1609_s5 + $0x30] ss:$8 sps:$4 sm:$0xff]  }
 0x276   :  { %v1136_v58 = vpop.f32.mrf.mxu1 }
 0x277   :  { %vm374_vm2 = vcmp.gt.f32.partialorder %v1442_v57, %v33_v55  ;;  %v1256_v55 = vld [vmem:[%s1609_s5 + $0x34] ss:$8 sps:$4 sm:$0xff]   ;;  %v1259_v58 = vld [vmem:[%s1609_s5 + $0x24] ss:$8 sps:$4 sm:$0xff]  }
 0x278   :  { %v1446_v59 = vsel %vm374_vm2, 1.0, %v1266_v1  ;;  %v366_v60 = vpop.f32.mrf.mxu1 }
 0x279   :  { %v380_v61 = vpack.c.bf16 %v1446_v59, %v1446_v59  ;;  %v1262_v60 = vld [vmem:[%s1609_s5 + $0x14] ss:$8 sps:$4 sm:$0xff]  }
 0x27a   :  { %v1137_v62 = vpop.f32.mrf.mxu1 }
 0x27b   :  { %1143 = vmatmul.mubr.msk.bf16.vlgmr.msra.gmra.mxu0 %vm393_vm3, %v380_v61  ;;  %v1260_v61 = vld [vmem:[%s1609_s5 + $0x10] ss:$8 sps:$4 sm:$0xff]  }
 0x27c   :  { %1166 = vmatprep.mubr.msk.bf16.mxu0 %vm1267_vm0, %v1266_v1  ;;  %1159 = vmatpush3.bf16.msra.mxu0 %v1230_v8 }
 0x27d   :  { %1160 = vmatprep.subr.bf16.mxu0 %v1266_v1 }
 0x280   :  { %1161 = vmatpush3.bf16.msra.mxu0 %v1231_v9 }
 0x281   :  { %1162 = vmatprep.subr.bf16.mxu0 %v1266_v1 }
 0x284   :  { %1163 = vmatpush3.bf16.msra.mxu0 %v1232_v15 }
 0x285   :  { %1164 = vmatprep.subr.bf16.mxu0 %v1266_v1 }
 0x288   :  { %1165 = vmatpush3.bf16.msra.mxu0 %v1233_v16 }
 0x289   :  { %1182 = vmatprep.subr.bf16.mxu0 %v1266_v1 }
 0x33b   :  { %v431_v2 = vpop.f32.mrf.mxu0 }
 0x33c   :  { %438 = vrot.lane.b32.xlu0 %v431_v2, %s1268_s0 }
 0x33d   :  { %v1144_v4 = vpop.f32.mrf.mxu0 }
 0x33e   :  { %v702_v4 = vrot.slane %v1407_v30, %v701_v3 }
 0x33f   :  { %v434_v5 = vpop.f32.mrf.mxu0 }
 0x341   :  { %v1145_v7 = vpop.f32.mrf.mxu0 }
 0x3ae   :  { %v439_v10 = vpop.permute.xlu0 %438 }
 0x3af   :  { %v441_v11 = vadd.f32 %v439_v10, %v1410_v36 }
 0x3b1   :  { %v442_v12 = vmax.f32 %v441_v11, 0.0 }
 0x3b3   :  { %v452_v13 = vpack.c.bf16 %v442_v12, %v442_v12  ;;  %v1263_v12 = vld [vmem:[%s1609_s5] ss:$8 sps:$4 sm:$0xff]  }
 0x3b5   :  { %454 = vrot.lane.b32.xlu0 %v452_v13, %s1268_s0  ;;  %v1271_v13 = vmov 0  }
 0x427   :  { %v455_v14 = vpop.permute.xlu0 %454 }
 0x428   :  { %1155 = vmatmul.mubr.msk.bf16.vlgmr.msra.gmra.mxu1 %vm242_vm1, %v455_v14  ;;  %v717_v14 = vsub.s32 6, %v1401_v28 }
 0x429   :  { %1178 = vmatprep.mubr.msk.bf16.mxu1 %vm1267_vm0, %v1266_v1  ;;  %1171 = vmatpush3.bf16.msra.mxu1 %v1234_v26 }
 0x42a   :  { %1172 = vmatprep.subr.bf16.mxu1 %v1266_v1  ;;  %v718_v15 = vrot.slane %v1407_v30, %v717_v14 }
 0x42d   :  { %1173 = vmatpush3.bf16.msra.mxu1 %v1235_v27 }
 0x42e   :  { %1174 = vmatprep.subr.bf16.mxu1 %v1266_v1 }
 0x431   :  { %1175 = vmatpush3.bf16.msra.mxu1 %v1236_v29 }
 0x432   :  { %1176 = vmatprep.subr.bf16.mxu1 %v1266_v1 }
 0x435   :  { %1177 = vmatpush3.bf16.msra.mxu1 %v1237_v31 }
 0x436   :  { %892 = vmatprep.subr.bf16.mxu1 %v1244_v49 }
 0x4e8   :  { %v517_v19 = vpop.f32.mrf.mxu1 }
 0x4e9   :  { %v527_v20 = vadd.f32 %v526_v18, %v517_v19 }
 0x4ea   :  { %v1156_v21 = vpop.f32.mrf.mxu1 }
 0x4eb   :  { %v528_v22 = vmax.f32 %v527_v20, 0.0 }
 0x4ec   :  { %v520_v23 = vpop.f32.mrf.mxu1 }
 0x4ed   :  { %v538_v24 = vpack.c.bf16 %v528_v22, %v528_v22  ;;  %v806_v23 = vsub.s32 7, %v1401_v28 }
 0x4ee   :  { %v1157_v25 = vpop.f32.mrf.mxu1 }
 0x4ef   :  { %1167 = vmatmul.mubr.msk.bf16.vlgmr.msra.gmra.mxu0 %vm242_vm1, %v538_v24  ;;  %v30_v24 = vld [vmem:[%s1606_s6 + $0x8] sm:$0xff]  ;;  %v807_v25 = vrot.slane %v1407_v30, %v806_v23 }
 0x4f0   :  { %1190 = vmatprep.mubr.msk.bf16.mxu0 %vm1267_vm0, %v1266_v1  ;;  %1183 = vmatpush3.bf16.msra.mxu0 %v1238_v41  ;;  %v811_v26 = vrot.slane %v30_v24, %v806_v23 }
 0x4f1   :  { %1184 = vmatprep.subr.bf16.mxu0 %v1266_v1 }
 0x4f4   :  { %1185 = vmatpush3.bf16.msra.mxu0 %v1239_v42 }
 0x4f5   :  { %1186 = vmatprep.subr.bf16.mxu0 %v1266_v1 }
 0x4f8   :  { %1187 = vmatpush3.bf16.msra.mxu0 %v1240_v46 }
 0x4f9   :  { %1188 = vmatprep.subr.bf16.mxu0 %v1266_v1 }
 0x4fc   :  { %1189 = vmatpush3.bf16.msra.mxu0 %v1241_v47 }
 0x5af   :  { %v600_v34 = vpop.f32.mrf.mxu0 }
 0x5b0   :  { %v610_v36 = vadd.f32 %v609_v33, %v600_v34 }
 0x5b1   :  { %v1168_v37 = vpop.f32.mrf.mxu0 }
 0x5b2   :  { %vm615_vm4 = vcmp.gt.f32.partialorder %v610_v36, %v613_v35  ;;  %936 = vrot.lane.b32.xlu0 %v610_v36, %s1270_s1 }
 0x5b3   :  { %v616_v38 = vsel %vm615_vm4, 1.0, %v1266_v1  ;;  %v603_v39 = vpop.f32.mrf.mxu0  ;;  %v1245_v1 = vld [vmem:[%s1609_s5 + $0x60] ss:$8 sps:$4 sm:$0xff]  }
 0x5b4   :  { %618 = vrot.lane.b32.xlu1 %v616_v38, %s1270_s1 }
 0x5b5   :  { %v1169_v40 = vpop.f32.mrf.mxu0 }
 0x624   :  { %v937_v62 = vpop.permute.xlu0 %936 }
 0x625   :  { %v943_v63 = vsel %vm393_vm3, %v1442_v57, %v937_v62  ;;  %v1265_v57 = vld [vmem:[%s1609_s5 + $0x4] ss:$8 sps:$4 sm:$0xff]  }
 0x626   :  { %v619_v43 = vpop.permute.xlu1 %618 }
 0x627   :  { %v621_v44 = vsel %vm393_vm3, %v1446_v59, %v619_v43  ;;  %v1257_v59 = vld [vmem:[%s1609_s5 + $0x20] ss:$8 sps:$4 sm:$0xff]  }
 0x628   :  { %940 = vrot.lane.b32.xlu1 %v621_v44, %s1268_s0  ;;  %v631_v45 = vpack.c.bf16 %v621_v44, %v621_v44 }
 0x62a   :  { %1179 = vmatmul.mubr.msk.bf16.vlgmr.msra.gmra.mxu1 %vm242_vm1, %v631_v45 }
 0x62b   :  { %893 = vmatpush1.bf16.msra.mxu1 %v1242_v48  ;;  %924 = vmatprep.mubr.bf16.mxu1 %v1271_v13 }
 0x62c   :  { %894 = vmatprep.subr.bf16.mxu1 %v1247_v50 }
 0x62f   :  { %895 = vmatpush1.bf16.msra.mxu1 %v1245_v1 }
 0x630   :  { %896 = vmatprep.subr.bf16.mxu1 %v1250_v51 }
 0x633   :  { %897 = vmatpush1.bf16.msra.mxu1 %v1248_v52 }
 0x634   :  { %898 = vmatprep.subr.bf16.mxu1 %v1253_v53 }
 0x637   :  { %899 = vmatpush1.bf16.msra.mxu1 %v1251_v54 }
 0x638   :  { %900 = vmatprep.subr.bf16.mxu1 %v1256_v55 }
 0x63b   :  { %901 = vmatpush1.bf16.msra.mxu1 %v1254_v56 }
 0x63c   :  { %902 = vmatprep.subr.bf16.mxu1 %v1259_v58 }
 0x63f   :  { %903 = vmatpush1.bf16.msra.mxu1 %v1257_v59 }
 0x640   :  { %904 = vmatprep.subr.bf16.mxu1 %v1262_v60 }
 0x643   :  { %905 = vmatpush1.bf16.msra.mxu1 %v1260_v61 }
 0x644   :  { %906 = vmatprep.subr.bf16.mxu1 %v1265_v57 }
 0x647   :  { %907 = vmatpush1.bf16.msra.mxu1 %v1263_v12 }
 0x69a   :  { %v941_v0 = vpop.permute.xlu1 %940 }
 0x69b   :  { %v944_v2 = vsel %vm242_vm1, %v943_v63, %v941_v0 }
 0x69c   :  { %945 = vst [vmem:[%s1610_s8] sm:$0xff] %v944_v2 }
 0x6ea   :  { %v693_v5 = vpop.f32.mrf.mxu1 }
 0x6eb   :  { %v703_v6 = vadd.f32 %v702_v4, %v693_v5 }
 0x6ec   :  { %v1180_v7 = vpop.f32.mrf.mxu1 }
 0x6ed   :  { %v704_v8 = vmax.f32 %v703_v6, 0.0 }
 0x6ee   :  { %v696_v9 = vpop.f32.mrf.mxu1 }
 0x6ef   :  { %v714_v10 = vpack.c.bf16 %v704_v8, %v704_v8 }
 0x6f0   :  { %v1181_v11 = vpop.f32.mrf.mxu1 }
 0x6f1   :  { %1191 = vmatmul.mubr.msk.bf16.vlgmr.msra.gmra.mxu0 %vm242_vm1, %v714_v10 }
 0x7b1   :  { %v780_v16 = vpop.f32.mrf.mxu0 }
 0x7b2   :  { %v781_v17 = vadd.f32 %v780_v16, %v718_v15 }
 0x7b3   :  { %v1192_v18 = vpop.f32.mrf.mxu0 }
 0x7b4   :  { %v786_v19 = vmax.f32 %v781_v17, 0.0 }
 0x7b5   :  { %v783_v20 = vpop.f32.mrf.mxu0 }
 0x7b6   :  { %v803_v21 = vpack.c.bf16 %v786_v19, %v786_v19 }
 0x7b7   :  { %v1193_v22 = vpop.f32.mrf.mxu0 }
 0x7b8   :  { %925 = vmatmul.mubr.bf16.vlgmr.msra.gmra.mxu1 %v803_v21 }
 0x878   :  { %v926_v27 = vpop.f32.mrf.mxu1 }
 0x879   :  { %v927_v29 = vadd.f32 %v926_v27, %v807_v25 }
 0x87a   :  { %v928_v31 = vpop.f32.mrf.mxu1 }
 0x87b   :  { %933 = vst [vmem:[%s1611_s7] sm:$0xff] %v927_v29  ;;  %v929_v32 = vadd.f32 %v928_v31, %v811_v26 }
 0x87c   :  { %v930_v33 = vpop.f32.mrf.mxu1 }
 0x87d   :  { %934 = vst [vmem:[%s1611_s7 + $0x8] sm:$0xff] %v929_v32 }
 0x87e   :  { %v931_v28 = vpop.f32.mrf.mxu1 }

</bundles_post_ra>
